<compile_context>
chip_gen: v6e
topology: v6e:2x2x1
jax: 0.10.0
libtpu: 0.0.40
codegen_flags: <defaults>
</compile_context>

<pallas_src>
import math

import jax
import jax.numpy as jnp
from jax.experimental import pallas as pl
from jax.experimental.pallas import tpu as pltpu


def _round_up(x, m):
    return ((x + m - 1) // m) * m


def _pad2d(a, rows, cols):
    r, c = a.shape
    if r == rows and c == cols:
        return a
    return jnp.pad(a, ((0, rows - r), (0, cols - c)))


def _pick_tile(dim_p, cap, min_tiles=1):
    """Largest multiple of 128 that divides dim_p (a 128-multiple), is <= cap,
    and (if possible) leaves at least `min_tiles` grid steps along that axis."""
    cap = min(cap, dim_p)
    if min_tiles > 1 and dim_p >= min_tiles * 128:
        cap = min(cap, dim_p // min_tiles)
    t = max(128, (cap // 128) * 128)
    while dim_p % t:
        t -= 128
    return t


def _make_gcn_kernel(*, w_in_epilogue, has_bias):
    """Fused GCN kernel.  Grid = (row_tiles, k_reduction_tiles).

    w_in_epilogue=True  : acc += adj @ x ; epilogue o = acc @ W (+ bias)
    w_in_epilogue=False : acc += adj @ (x @ W) ; epilogue o = acc (+ bias)
    """

    def kernel(adj_ref, x_ref, w_ref, *rest):
        if has_bias:
            bias_ref, o_ref, acc_ref = rest
        else:
            (o_ref, acc_ref) = rest
            bias_ref = None

        k = pl.program_id(1)

        @pl.when(k == 0)
        def _():
            acc_ref[...] = jnp.zeros_like(acc_ref)

        if w_in_epilogue:
            acc_ref[...] += jnp.dot(
                adj_ref[...], x_ref[...], preferred_element_type=jnp.float32
            )
        else:
            # Small per-step matmul against the resident weight; extra MXU work
            # ~ in_f / tile_m of the main term.
            sup = jnp.dot(
                x_ref[...], w_ref[...], preferred_element_type=jnp.float32
            )
            acc_ref[...] += jnp.dot(
                adj_ref[...],
                sup.astype(adj_ref.dtype),
                preferred_element_type=jnp.float32,
            )

        @pl.when(k == pl.num_programs(1) - 1)
        def _():
            if w_in_epilogue:
                # f32 accumulator x f32-cast weight: intermediate never leaves
                # f32, runs once per row tile -> negligible cost.
                out = jnp.dot(
                    acc_ref[...],
                    w_ref[...].astype(jnp.float32),
                    preferred_element_type=jnp.float32,
                )
            else:
                out = acc_ref[...]
            if has_bias:
                out = out + bias_ref[...].astype(jnp.float32)
            o_ref[...] = out.astype(o_ref.dtype)

    return kernel


def graph_convolution(x, adj, weight, bias=None, *, compute_dtype=None,
                      tile_m=1024, tile_k=512,
                      vmem_limit_bytes=32 * 1024 * 1024):
    """Fused Pallas GCN forward: adj @ (x @ weight) [+ bias].

    x: (N, in_f), adj: (N, N), weight: (in_f, out_f), bias: (out_f,) or None.

    compute_dtype=jnp.bfloat16 halves HBM traffic on v5e/v6e/v7x; f32
    accumulation is preserved.  For multi-layer GCNs, cast adj once outside
    this call so the N x N cast copy is not repeated every layer.
    """
    N, in_f = x.shape
    Na, Nb = adj.shape
    assert Na == Nb == N, (x.shape, adj.shape)
    in_f_w, out_f = weight.shape
    assert in_f_w == in_f, (x.shape, weight.shape)

    out_dtype = x.dtype
    if compute_dtype is not None:
        # .astype is a no-op when the dtype already matches (pre-cast adj!).
        x = x.astype(compute_dtype)
        adj = adj.astype(compute_dtype)
        weight = weight.astype(compute_dtype)
        if bias is not None:
            bias = bias.astype(compute_dtype)

    # Pad only to 128-multiples (zero padding is benign for the reduction).
    Np = _round_up(N, 128)
    Fin_p = _round_up(in_f, 128)
    Fout_p = _round_up(out_f, 128)

    adj_p = _pad2d(adj, Np, Np)
    x_p = _pad2d(x, Np, Fin_p)
    w_p = _pad2d(weight, Fin_p, Fout_p)

    # Contraction order: keep the N x N matmul's lane width at min(in_f,out_f).
    w_in_epilogue = in_f <= out_f
    acc_w = Fin_p if w_in_epilogue else Fout_p

    # Tiles divide the 128-padded dims (no extra tile-multiple pad copy of adj).
    # Row axis keeps >= 2 tiles when possible so v7x's two TensorCores both work.
    tm = _pick_tile(Np, tile_m, min_tiles=2)
    tk = _pick_tile(Np, tile_k, min_tiles=1)
    grid = (Np // tm, Np // tk)

    in_specs = [
        pl.BlockSpec((tm, tk), lambda i, k: (i, k)),         # adj tile
        pl.BlockSpec((tk, Fin_p), lambda i, k: (k, 0)),      # x tile (reduction)
        pl.BlockSpec((Fin_p, Fout_p), lambda i, k: (0, 0)),  # W: resident
    ]
    args = [adj_p, x_p, w_p]

    has_bias = bias is not None
    if has_bias:
        bias_p = jnp.pad(bias, (0, Fout_p - out_f)).reshape(1, Fout_p)
        in_specs.append(pl.BlockSpec((1, Fout_p), lambda i, k: (0, 0)))
        args.append(bias_p)

    kernel = _make_gcn_kernel(w_in_epilogue=w_in_epilogue, has_bias=has_bias)

    itm = jnp.dtype(adj_p.dtype).itemsize
    n_row_tiles = Np // tm
    cost = pl.CostEstimate(
        flops=int(2 * Np * Np * acc_w + 2 * Np * Fin_p * Fout_p),
        transcendentals=0,
        bytes_accessed=int(
            adj_p.size * itm
            + x_p.size * itm * n_row_tiles          # x re-read per row tile
            + w_p.size * itm
            + Np * Fout_p * jnp.dtype(out_dtype).itemsize
        ),
    )

    out = pl.pallas_call(
        kernel,
        out_shape=jax.ShapeDtypeStruct((Np, Fout_p), out_dtype),
        grid=grid,
        in_specs=in_specs,
        out_specs=pl.BlockSpec((tm, Fout_p), lambda i, k: (i, 0)),
        scratch_shapes=[pltpu.VMEM((tm, acc_w), jnp.float32)],
        compiler_params=pltpu.CompilerParams(
            dimension_semantics=("parallel", "arbitrary"),
            vmem_limit_bytes=vmem_limit_bytes,
        ),
        cost_estimate=cost,
    )(*args)

    if (Np, Fout_p) != (N, out_f):
        out = out[:N, :out_f]
    return out


def init_params(key, in_features, out_features, bias=True, dtype=jnp.float32):
    """Mirrors GraphConvolution.reset_parameters: U(-stdv, stdv), stdv=1/sqrt(out)."""
    stdv = 1.0 / math.sqrt(out_features)
    kw, kb = jax.random.split(key)
    weight = jax.random.uniform(
        kw, (in_features, out_features), dtype=dtype, minval=-stdv, maxval=stdv
    )
    b = None
    if bias:
        b = jax.random.uniform(
            kb, (out_features,), dtype=dtype, minval=-stdv, maxval=stdv
        )
    return weight, b


if __name__ == "__main__":
    key = jax.random.PRNGKey(0)
    k_x, k_adj, k_p, k_x2, k_p2 = jax.random.split(key, 5)

    N = 300      # nodes (non-multiple of 128 -> exercises padding + slicing)
    IN_F = 72
    OUT_F = 200

    x = jax.random.normal(k_x, (N, IN_F), dtype=jnp.float32)
    a = jax.random.uniform(k_adj, (N, N), dtype=jnp.float32)
    adj = (a + a.T) * 0.5
    adj = adj / jnp.sum(adj, axis=-1, keepdims=True)

    hp = jax.lax.Precision.HIGHEST

    # ---- Path A: in_f < out_f -> (adj @ x) @ W applied in the epilogue ----
    weight, bias = init_params(k_p, IN_F, OUT_F, bias=True)
    out = jax.block_until_ready(graph_convolution(x, adj, weight, bias))
    ref = jnp.dot(adj, jnp.dot(x, weight, precision=hp), precision=hp) + bias
    assert out.shape == (N, OUT_F)
    assert jnp.allclose(out, ref, atol=2e-3, rtol=2e-3)

    out_nb = jax.block_until_ready(graph_convolution(x, adj, weight, None))
    ref_nb = jnp.dot(adj, jnp.dot(x, weight, precision=hp), precision=hp)
    assert jnp.allclose(out_nb, ref_nb, atol=2e-3, rtol=2e-3)

    # ---- Path B: in_f > out_f -> per-step adj @ (x @ W) ----
    x2 = jax.random.normal(k_x2, (N, OUT_F), dtype=jnp.float32)
    weight2, bias2 = init_params(k_p2, OUT_F, IN_F, bias=True)
    out2 = jax.block_until_ready(graph_convolution(x2, adj, weight2, bias2))
    ref2 = jnp.dot(adj, jnp.dot(x2, weight2, precision=hp), precision=hp) + bias2
    assert out2.shape == (N, IN_F)
    assert jnp.allclose(out2, ref2, atol=2e-3, rtol=2e-3)

    print("KERNEL_OK")
</pallas_src>

<mosaic_0001>
module attributes {stable_mosaic.version = 11 : i64} {
  func.func @kernel(%arg0: i32, %arg1: i32, %arg2: memref<128x384xf32, #tpu.memory_space<vmem>>, %arg3: memref<384x128xf32, #tpu.memory_space<vmem>>, %arg4: memref<128x256xf32, #tpu.memory_space<vmem>>, %arg5: memref<1x256xf32, #tpu.memory_space<vmem>>, %arg6: memref<128x256xf32, #tpu.memory_space<vmem>>, %arg7: memref<128x128xf32, #tpu.memory_space<vmem>>) attributes {dimension_semantics = [#tpu.dimension_semantics<parallel>, #tpu.dimension_semantics<arbitrary>], iteration_bounds = array<i64: 3, 1>, scalar_prefetch = 0 : i64, scratch_operands = 1 : i64, tpu.core_type = #tpu.core_type<tc>, window_params = [{transform_indices = @transform_0, window_bounds = array<i64: 128, 384>}, {transform_indices = @transform_1, window_bounds = array<i64: 384, 128>}, {pipeline_mode = #tpu.pipeline_mode<synchronous>, transform_indices = @transform_2, window_bounds = array<i64: 128, 256>}, {pipeline_mode = #tpu.pipeline_mode<synchronous>, transform_indices = @transform_3, window_bounds = array<i64: 1, 256>}, {transform_indices = @transform_4, window_bounds = array<i64: 128, 256>}]} {
    %c0_i32 = arith.constant 0 : i32
    %0 = arith.cmpi eq, %arg1, %c0_i32 : i32
    %1 = arith.extui %0 : i1 to i32
    %c0_i32_0 = arith.constant 0 : i32
    %2 = arith.cmpi ne, %1, %c0_i32_0 : i32
    scf.if %2 {
      %cst_10 = arith.constant 0.000000e+00 : f32
      %12 = vector.broadcast %cst_10 : f32 to vector<128x128xf32>
      %c0_11 = arith.constant 0 : index
      %c0_12 = arith.constant 0 : index
      %13 = vector.load %arg7[%c0_11, %c0_12] : memref<128x128xf32, #tpu.memory_space<vmem>>, vector<128x128xf32>
      tpu.vector_store %arg7[%c0_11, %c0_12], %12 {strides = array<i32>} : memref<128x128xf32, #tpu.memory_space<vmem>>, vector<128x128xf32>,
    } else {
    }
    %c0 = arith.constant 0 : index
    %c0_1 = arith.constant 0 : index
    %3 = vector.load %arg7[%c0, %c0_1] : memref<128x128xf32, #tpu.memory_space<vmem>>, vector<128x128xf32>
    %c0_2 = arith.constant 0 : index
    %c0_3 = arith.constant 0 : index
    %4 = vector.load %arg2[%c0_2, %c0_3] : memref<128x384xf32, #tpu.memory_space<vmem>>, vector<128x384xf32>
    %c0_4 = arith.constant 0 : index
    %c0_5 = arith.constant 0 : index
    %5 = vector.load %arg3[%c0_4, %c0_5] : memref<384x128xf32, #tpu.memory_space<vmem>>, vector<384x128xf32>
    %cst = arith.constant dense<0.000000e+00> : vector<128x128xf32>
    %6 = tpu.matmul %4, %5, %cst {dimension_numbers = #tpu.dot_dimension_numbers<[1], [0], [0], [1], [0, 0, 1, 1], [], []>} : vector<128x384xf32>, vector<384x128xf32>, vector<128x128xf32> -> vector<128x128xf32>
    %7 = arith.addf %3, %6 : vector<128x128xf32>
    %c0_6 = arith.constant 0 : index
    %c0_7 = arith.constant 0 : index
    %8 = vector.load %arg7[%c0_6, %c0_7] : memref<128x128xf32, #tpu.memory_space<vmem>>, vector<128x128xf32>
    tpu.vector_store %arg7[%c0_6, %c0_7], %7 {strides = array<i32>} : memref<128x128xf32, #tpu.memory_space<vmem>>, vector<128x128xf32>,
    %c0_i32_8 = arith.constant 0 : i32
    %9 = arith.cmpi eq, %arg1, %c0_i32_8 : i32
    %10 = arith.extui %9 : i1 to i32
    %c0_i32_9 = arith.constant 0 : i32
    %11 = arith.cmpi ne, %10, %c0_i32_9 : i32
    scf.if %11 {
      %c0_10 = arith.constant 0 : index
      %c0_11 = arith.constant 0 : index
      %12 = vector.load %arg7[%c0_10, %c0_11] : memref<128x128xf32, #tpu.memory_space<vmem>>, vector<128x128xf32>
      %c0_12 = arith.constant 0 : index
      %c0_13 = arith.constant 0 : index
      %13 = vector.load %arg4[%c0_12, %c0_13] : memref<128x256xf32, #tpu.memory_space<vmem>>, vector<128x256xf32>
      %cst_14 = arith.constant dense<0.000000e+00> : vector<128x256xf32>
      %14 = tpu.matmul %12, %13, %cst_14 {dimension_numbers = #tpu.dot_dimension_numbers<[1], [0], [0], [1], [0, 0, 1, 1], [], []>} : vector<128x128xf32>, vector<128x256xf32>, vector<128x256xf32> -> vector<128x256xf32>
      %c0_15 = arith.constant 0 : index
      %c0_16 = arith.constant 0 : index
      %15 = vector.load %arg5[%c0_15, %c0_16] : memref<1x256xf32, #tpu.memory_space<vmem>>, vector<1x256xf32>
      %16 = vector.broadcast %15 : vector<1x256xf32> to vector<128x256xf32>
      %17 = arith.addf %14, %16 : vector<128x256xf32>
      %c0_17 = arith.constant 0 : index
      %c0_18 = arith.constant 0 : index
      %18 = vector.load %arg6[%c0_17, %c0_18] : memref<128x256xf32, #tpu.memory_space<vmem>>, vector<128x256xf32>
      tpu.vector_store %arg6[%c0_17, %c0_18], %17 {strides = array<i32>} : memref<128x256xf32, #tpu.memory_space<vmem>>, vector<128x256xf32>,
    } else {
    }
    return
  }
  func.func @transform_0(%arg0: i32, %arg1: i32) -> (i32, i32) {
    %c0_i32 = arith.constant 0 : i32
    return %arg0, %arg1 : i32, i32
  }
  func.func @transform_1(%arg0: i32, %arg1: i32) -> (i32, i32) {
    %c0_i32 = arith.constant 0 : i32
    %c0_i32_0 = arith.constant 0 : i32
    return %arg1, %c0_i32 : i32, i32
  }
  func.func @transform_2(%arg0: i32, %arg1: i32) -> (i32, i32) {
    %c0_i32 = arith.constant 0 : i32
    %c0_i32_0 = arith.constant 0 : i32
    %c0_i32_1 = arith.constant 0 : i32
    return %c0_i32, %c0_i32_0 : i32, i32
  }
  func.func @transform_3(%arg0: i32, %arg1: i32) -> (i32, i32) {
    %c0_i32 = arith.constant 0 : i32
    %c0_i32_0 = arith.constant 0 : i32
    %c0_i32_1 = arith.constant 0 : i32
    return %c0_i32, %c0_i32_0 : i32, i32
  }
  func.func @transform_4(%arg0: i32, %arg1: i32) -> (i32, i32) {
    %c0_i32 = arith.constant 0 : i32
    %c0_i32_0 = arith.constant 0 : i32
    return %arg0, %c0_i32 : i32, i32
  }
}

</mosaic_0001>

<bundles_post_ra>
// kernel: tpu_custom_call.1
= control target key start
LH: loop header
LB: loop body
LE: loop exit
PB: predicated region body
PF: predicated region fallthrough
CT: control target
= control target key end

     0   :  { %s2013_s0 = inlined_call_operand.hbm [shape: f32[384,384], index: 0, kind: input, shape index: {}]   ;;  %s2014_s1 = inlined_call_operand.hbm [shape: f32[384,128], index: 1, kind: input, shape index: {}]   ;;  %s2015_s2 = inlined_call_operand.hbm [shape: f32[128,256], index: 2, kind: input, shape index: {}]   ;;  %s2016_s3 = inlined_call_operand.vmem [shape: f32[1,256], index: 3, kind: input, shape index: {}]   ;;  %s2017_s4 = inlined_call_operand.hbm [shape: f32[384,256], index: 4, kind: output, shape index: {}]  }
   0x1   :  { %2021 = sst [smem:[#allocation13_spill]] %s2014_s1 }
   0x2   :  { %9 = vsyncpa [#allocation4], 0 }
   0x3   :  { %11 = vsyncpa [#allocation4 + $0x1], 0 }
   0x4   :  { %12 = vsyncpa [#allocation7], 0 }
   0x5   :  { %13 = vsyncpa [#allocation5], 0 }
   0x6   :  { %15 = vsyncpa [#allocation5 + $0x1], 0  ;;  %s1624_s15 = smov 0   ;;  %s1626_s16 = smov 0  }
   0x7   :  { %s1628_s17 = smov 0   ;;  %s1630_s18 = smov 0  }
   0x8   :  { %s1632_s19 = smov 0   ;;  %s1634_s20 = smov 0  }
   0x9 LB: > { %s1104_s21 = sadd.s32 4294967295, %s1584_s20   ;;  %s1105_s22 = sadd.s32 4294967294, %s1584_s20   ;;  %s1584_s20 = sphi %s1634_s20, %s21_s20   ;;  %s1580_s19 = sphi %s1632_s19, %s2038_s19   ;;  %s1576_s18 = sphi %s1630_s18, %s2037_s18   ;;  %s1572_s17 = sphi %s1628_s17, %s2036_s17   ;;  %s1568_s16 = sphi %s1626_s16, %s2035_s16   ;;  %s1564_s15 = sphi %s1624_s15, %s2034_s15  }
   0xa   : > { %p55_p0 = scmp.ne.s32.totalorder %s1568_s16, %s1564_s15  ;;  %p1658_p1 = scmp.eq.s32.totalorder %s1104_s21, 0 }
   0xb   : > { %p1662_p2 = scmp.eq.s32.totalorder %s1104_s21, 2  ;;  %p153_p3 = scmp.eq.s32.totalorder %s1105_s22, 2 }
   0xc   : > { %s2022_s23 = scalar_select %p1658_p1, 1, 0 }
   0xd   : > { %p1668_p4 = por %p1658_p1, %p55_p0  ;;  %p1106_p5 = scmp.ge.s32.totalorder %s1584_s20, 1 }
   0xe   : > { %p1673_p6 = por %p153_p3, %p55_p0  ;;  %p160_p7 = scmp.lt.s32.totalorder %s1584_s20, 4 }
   0xf   : > { %s2024_s25 = scalar_select %p1668_p4, 1, 0 }
  0x10   : > { %s2025_s26 = scalar_select %p1673_p6, 1, 0 }
  0x11   : > { %p1678_p8 = pnand %p1106_p5, %p160_p7  ;;  %s1586_s28 = smov [#allocation6]  }
  0x12   : > { %s175_s29 = sshll.u32 %s1586_s28, 4  ;;  %s1587_s5 = smov [#allocation8]   ;;  %s176_s29 = int_to_ptr.vmem [resolvable:$true] %s175_s29 }
  0x13   : > { %p1340_p9 = pneg %p1678_p8  ;;  %s188_s6 = sshll.u32 %s1587_s5, 4  ;;  %s189_s6 = int_to_ptr.vmem [resolvable:$true] %s188_s6 }
  0x14   : > { %s1431_s7 = scalar_lea.vmem %s176_s29, 6144  ;;  %p1439_p3 = scmp.lt.s32.totalorder %s176_s29, %s176_s29 }
  0x15   : > { %p1686_p10 = pnand %p1340_p9, %p1658_p1  ;;  %p1432_p12 = scmp.ne.s32.totalorder %s176_s29, %s1431_s7 }
  0x16   : > { %p1440_p5 = scmp.lt.s32.totalorder %s1431_s7, %s1431_s7 }
  0x17   : > { %p1422_p11 = pneg %p1686_p10 }
  0x18   : > { %p1441_p7 = por %p1440_p5, %p1439_p3 }
  0x19   : > { %p1434_p13 = pnand %p1432_p12, %p1422_p11 }
  0x1b   : > { %p1435_p0 = pneg %p1434_p13 }
  0x1d   : > { %p1442_p9 = pnand %p1441_p7, %p1435_p0 }
  0x1f   : > { %1445 = shalt.err (!%p1442_p9)
}
  0x20   : > { %s1588_s8 = smov 128   ;;  %s1589_s9 = smov 8  }
  0x21   : > { %s2028_s1 = sld [smem:[#allocation13_spill]]  ;;  %s1457_s12 = scalar_lea.vmem %s189_s6, 4096 }
  0x22   : > { %p1458_p6 = scmp.ne.s32.totalorder %s189_s6, %s1457_s12  ;;  %p1465_p1 = scmp.lt.s32.totalorder %s189_s6, %s189_s6 }
  0x23   : > { %p1466_p4 = scmp.lt.s32.totalorder %s1457_s12, %s1457_s12 }
  0x24   : > { %p1460_p12 = pnand %p1458_p6, %p1422_p11 }
  0x25   : > { %p1467_p3 = por %p1466_p4, %p1465_p1 }
  0x26   : > { %p1461_p13 = pneg %p1460_p12 }
  0x27   : > { %1343 = dma.hbm_to_vmem [thread:$0]  (!%p1686_p10), %s2028_s1, 6144, %s176_s29, [#allocation7], %s1588_s8, %s1588_s8, %s1589_s9  }
  0x28   : > { %p1468_p0 = pnand %p1467_p3, %p1461_p13 }
  0x2a   : > { %1471 = shalt.err (!%p1468_p0)
}
  0x2b   : > { %s1590_s13 = smov 256   ;;  %s1591_s14 = smov 16  }
  0x2c   : > { %1346 = dma.hbm_to_vmem [thread:$0]  (!%p1686_p10), %s2015_s2, 4096, %s189_s6, [#allocation7], %s1590_s13, %s1590_s13, %s1591_s14  }
  0x2d   : > { %s33_s28 = sadd.s32 1, %s1580_s19  ;;  %s42_s29 = sadd.s32 1, %s1572_s17 }
  0x2e   : > { %p35_p1 = scmp.ge.s32.totalorder %s33_s28, 3  ;;  %p49_p4 = scmp.ne.s32.totalorder %s1572_s17, %s1568_s16 }
  0x2f   : > { %p50_p6 = scmp.eq.s32.totalorder %s1584_s20, 0  ;;  %p1357_p11 = scmp.lt.s32.totalorder %s1584_s20, 3 }
  0x30   : > { %s2040_s28 = smov (%p35_p1, %s33_s28), 0  ;;  %p1718_p7 = por %p1662_p2, %p49_p4 }
  0x31   : > { %p51_p5 = por %p50_p6, %p49_p4  ;;  %s37_s30 = ssub.s32 %s1580_s19, %s2040_s28 }
  0x32   : > { %s205_s7 = sand.u32 1, %s1572_s17   ;;  %p40_p9 = scmp.eq.s32.totalorder %s37_s30, 0 }
  0x33   : > { %s1325_s6 = smul.u32 384, %s205_s7  ;;  %p1725_p10 = pnand %p1357_p11, %p51_p5 }
  0x34   : > { %s1730_s9 = scalar_select %p40_p9, %s1572_s17, %s42_s29  }
  0x35   : > { %s1326_s10 = smul.u32 6144, %s1580_s19  ;;  %s209_s11 = scalar_lea.vmem [#allocation3], %s1325_s6 }
  0x36   : > { %s219_s12 = sshll.u32 %s209_s11, 4  ;;  %s206_s21 = scalar_lea.sflag [#allocation4], %s205_s7  ;;  %s220_s12 = int_to_ptr.vmem [resolvable:$true] %s219_s12 }
  0x37   : > { %s218_s14 = scalar_lea.hbm %s2013_s0, %s1326_s10  ;;  %p1474_p2 = pneg %p1725_p10 }
  0x38   : > { %s1485_s22 = scalar_lea.vmem %s220_s12, 6144  ;;  %s1592_s30 = smov [#allocation3]  }
  0x39   : > { %p1486_p12 = scmp.ne.s32.totalorder %s220_s12, %s1485_s22  ;;  %s1490_s1 = sshll.u32 %s1592_s30, 4  ;;  %s1491_s1 = int_to_ptr.vmem [resolvable:$false] %s1490_s1 }
  0x3a   : > { %s1492_s29 = scalar_lea.vmem %s1491_s1, 12288  ;;  %p1493_p0 = scmp.lt.s32.totalorder %s220_s12, %s1491_s1 }
  0x3b   : > { %p1488_p13 = pnand %p1486_p12, %p1474_p2  ;;  %p1494_p1 = scmp.lt.s32.totalorder %s1492_s29, %s1485_s22 }
  0x3d   : > { %p1489_p3 = pneg %p1488_p13  ;;  %p1495_p4 = por %p1494_p1, %p1493_p0 }
  0x3f   : > { %p1496_p6 = pnand %p1495_p4, %p1489_p3 }
  0x41   : > { %1499 = shalt.err (!%p1496_p6)
}
  0x42   : > { %s1593_s6 = smov 384   ;;  %s1594_s10 = smov 24  }
  0x43   : > { %1350 = dma.hbm_to_vmem [thread:$0]  (!%p1725_p10), %s218_s14, 6144, %s220_s12, %s206_s21, %s1593_s6, %s1593_s6, %s1594_s10  }
  0x44   : > { %231 = sbr.rel (%p1678_p8) target bundleno = 581 (0x245), region = 36  ;;  %s1743_s7 = sand.u32 (!%p1678_p8), 1, %s1568_s16  }
  0x45   : > { %s1327_s11 = smul.u32 (!%p1678_p8), 384, %s1743_s7  ;;  %s234_s1 = scalar_lea.sflag (!%p1678_p8), [#allocation4], %s1743_s7 }
  0x46   : > { %p2031_p11 = scmp.ne.s32.totalorder (!%p1678_p8), %s2024_s25, 0 }
  0x47   : > { %s1747_s13 = scalar_lea.vmem (!%p1678_p8), [#allocation3], %s1327_s11 }
  0x49   : > { %1551 = dma.done.wait (%p2031_p11), %s234_s1, 6144  }
  0x4a   : > { %1553 = vsyncadd (%p2031_p11), %s234_s1, 4294961152  ;;  %p2032_p5 = scmp.ne.s32.totalorder %s2022_s23, 0 }
  0x4c   : > { %1555 = dma.done.wait (%p2032_p5), [#allocation7], 10240  }
  0x4d   : > { %1557 = vsyncadd (%p2032_p5), [#allocation7], 4294957056  ;;  %v389_v0 = vld [vmem:[#allocation6 + $0xf8] sm:$0xff]  ;;  %v388_v2 = vld [vmem:[#allocation6 + $0xf0] sm:$0xff]  ;;  %s1116_s27 = sshll.u32 %s1743_s7, 8  ;;  %s1124_s12 = sshll.u32 %s1576_s18, 12 }
  0x4e   : > { %v373_v1 = vld [vmem:[#allocation6 + $0x78] sm:$0xff]  ;;  %1125 = vmatprep.subr.mxu0 %v389_v0  ;;  %v372_v4 = vld [vmem:[#allocation6 + $0x70] sm:$0xff]  ;;  %v387_v5 = vld [vmem:[#allocation6 + $0xe8] sm:$0xff]  ;;  %s1894_s8 = scalar_lea.vmem [#allocation9], %s1116_s27  ;;  %s1961_s22 = scalar_lea.hbm %s2017_s4, %s1124_s12 }
  0x4f   : > { %v405_v3 = vld [vmem:[#allocation6 + $0x178] sm:$0xff]  ;;  %1126 = vmatpush3.msra.mxu0 %v373_v1  ;;  %v404_v6 = vld [vmem:[#allocation6 + $0x170] sm:$0xff]  ;;  %v371_v7 = vld [vmem:[#allocation6 + $0x68] sm:$0xff]  ;;  %s999_s24 = sshll.u32 %s1894_s8, 4  ;;  %s985_s18 = scalar_lea.sflag [#allocation5], %s1743_s7  ;;  %s1963_s24 = int_to_ptr.vmem [resolvable:$true] %s999_s24 }
  0x50   : > { %1237 = vmatprep.subr.mxu1 %v405_v3  ;;  %1127 = vmatprep.subr.mxu0 %v388_v2  ;;  %v403_v8 = vld [vmem:[#allocation6 + $0x168] sm:$0xff]  ;;  %v386_v9 = vld [vmem:[#allocation6 + $0xe0] sm:$0xff]  ;;  %v385_v12 = vld [vmem:[#allocation6 + $0xd8] sm:$0xff]  ;;  %s1500_s30 = scalar_lea.vmem %s1963_s24, 4096  ;;  %s1596_s29 = smov [#allocation9]  }
  0x51   : > { %1238 = vmatpush3.msra.mxu1 %v405_v3  ;;  %1128 = vmatpush3.msra.mxu0 %v372_v4  ;;  %v370_v10 = vld [vmem:[#allocation6 + $0x60] sm:$0xff]  ;;  %v369_v13 = vld [vmem:[#allocation6 + $0x58] sm:$0xff]  ;;  %v384_v15 = vld [vmem:[#allocation6 + $0xd0] sm:$0xff]  ;;  %p1501_p8 = scmp.ne.s32.totalorder %s1963_s24, %s1500_s30  ;;  %s1504_s6 = sshll.u32 %s1596_s29, 4  ;;  %s1505_s6 = int_to_ptr.vmem [resolvable:$false] %s1504_s6 }
  0x52   : > { %1239 = vmatprep.subr.mxu1 %v404_v6  ;;  %1129 = vmatprep.subr.mxu0 %v387_v5  ;;  %v402_v11 = vld [vmem:[#allocation6 + $0x160] sm:$0xff]  ;;  %v401_v14 = vld [vmem:[#allocation6 + $0x158] sm:$0xff]  ;;  %v368_v16 = vld [vmem:[#allocation6 + $0x50] sm:$0xff]  ;;  %s1506_s10 = scalar_lea.vmem %s1505_s6, 8192  ;;  %p1507_p2 = scmp.lt.s32.totalorder %s1963_s24, %s1505_s6 }
  0x53   : > { %1240 = vmatpush3.msra.mxu1 %v404_v6  ;;  %1130 = vmatpush3.msra.mxu0 %v371_v7  ;;  %v400_v17 = vld [vmem:[#allocation6 + $0x150] sm:$0xff]  ;;  %v383_v18 = vld [vmem:[#allocation6 + $0xc8] sm:$0xff]  ;;  %v382_v21 = vld [vmem:[#allocation6 + $0xc0] sm:$0xff]  ;;  %p1502_p9 = pnand %p1501_p8, %p1718_p7  ;;  %p1508_p12 = scmp.lt.s32.totalorder %s1506_s10, %s1500_s30 }
  0x54   : > { %1241 = vmatprep.subr.mxu1 %v403_v8  ;;  %1131 = vmatprep.subr.mxu0 %v386_v9  ;;  %v367_v19 = vld [vmem:[#allocation6 + $0x48] sm:$0xff]  ;;  %v366_v22 = vld [vmem:[#allocation6 + $0x40] sm:$0xff]  ;;  %v381_v24 = vld [vmem:[#allocation6 + $0xb8] sm:$0xff] }
  0x55   : > { %1242 = vmatpush3.msra.mxu1 %v403_v8  ;;  %1132 = vmatpush3.msra.mxu0 %v370_v10  ;;  %v399_v20 = vld [vmem:[#allocation6 + $0x148] sm:$0xff]  ;;  %v398_v23 = vld [vmem:[#allocation6 + $0x140] sm:$0xff]  ;;  %v365_v25 = vld [vmem:[#allocation6 + $0x38] sm:$0xff]  ;;  %p1503_p10 = pneg %p1502_p9  ;;  %p1509_p13 = por %p1508_p12, %p1507_p2 }
  0x56   : > { %1243 = vmatprep.subr.mxu1 %v402_v11  ;;  %1133 = vmatprep.subr.mxu0 %v385_v12  ;;  %v397_v26 = vld [vmem:[#allocation6 + $0x138] sm:$0xff]  ;;  %v380_v27 = vld [vmem:[#allocation6 + $0xb0] sm:$0xff]  ;;  %v379_v30 = vld [vmem:[#allocation6 + $0xa8] sm:$0xff] }
  0x57   : > { %1244 = vmatpush3.msra.mxu1 %v402_v11  ;;  %1134 = vmatpush3.msra.mxu0 %v369_v13  ;;  %v364_v28 = vld [vmem:[#allocation6 + $0x30] sm:$0xff]  ;;  %v363_v31 = vld [vmem:[#allocation6 + $0x28] sm:$0xff]  ;;  %v378_v33 = vld [vmem:[#allocation6 + $0xa0] sm:$0xff]  ;;  %p1510_p3 = pnand %p1509_p13, %p1503_p10 }
  0x58   : > { %1245 = vmatprep.subr.mxu1 %v401_v14  ;;  %1135 = vmatprep.subr.mxu0 %v384_v15  ;;  %v396_v29 = vld [vmem:[#allocation6 + $0x130] sm:$0xff]  ;;  %v395_v32 = vld [vmem:[#allocation6 + $0x128] sm:$0xff]  ;;  %v362_v34 = vld [vmem:[#allocation6 + $0x20] sm:$0xff] }
  0x59   : > { %1246 = vmatpush3.msra.mxu1 %v401_v14  ;;  %1136 = vmatpush3.msra.mxu0 %v368_v16  ;;  %v394_v35 = vld [vmem:[#allocation6 + $0x120] sm:$0xff]  ;;  %v377_v36 = vld [vmem:[#allocation6 + $0x98] sm:$0xff]  ;;  %v376_v39 = vld [vmem:[#allocation6 + $0x90] sm:$0xff] }
  0x5a   : > { %1247 = vmatprep.subr.mxu1 %v400_v17  ;;  %1137 = vmatprep.subr.mxu0 %v383_v18  ;;  %v361_v37 = vld [vmem:[#allocation6 + $0x18] sm:$0xff]  ;;  %v360_v40 = vld [vmem:[#allocation6 + $0x10] sm:$0xff]  ;;  %v375_v42 = vld [vmem:[#allocation6 + $0x88] sm:$0xff] }
  0x5b   : > { %1248 = vmatpush3.msra.mxu1 %v400_v17  ;;  %1138 = vmatpush3.msra.mxu0 %v367_v19  ;;  %v393_v38 = vld [vmem:[#allocation6 + $0x118] sm:$0xff]  ;;  %v392_v41 = vld [vmem:[#allocation6 + $0x110] sm:$0xff]  ;;  %v359_v43 = vld [vmem:[#allocation6 + $0x8] sm:$0xff] }
  0x5c   : > { %1249 = vmatprep.subr.mxu1 %v399_v20  ;;  %1139 = vmatprep.subr.mxu0 %v382_v21  ;;  %v391_v44 = vld [vmem:[#allocation6 + $0x108] sm:$0xff]  ;;  %v374_v45 = vld [vmem:[#allocation6 + $0x80] sm:$0xff]  ;;  %v312_v50 = vld [vmem:[%s1747_s13 + $0x10] sm:$0xff] }
  0x5d   : > { %1250 = vmatpush3.msra.mxu1 %v399_v20  ;;  %1140 = vmatpush3.msra.mxu0 %v366_v22  ;;  %v311_v46 = vld [vmem:[%s1747_s13 + $0x8] sm:$0xff]  ;;  %v358_v47 = vld [vmem:[#allocation6] sm:$0xff]  ;;  %v778_v54 = vld [vmem:[#allocation8 + $0xf8] sm:$0xff] }
  0x5e   : > { %1251 = vmatprep.subr.mxu1 %v398_v23  ;;  %1141 = vmatprep.subr.mxu0 %v381_v24  ;;  %v310_v48 = vld [vmem:[%s1747_s13] sm:$0xff]  ;;  %v315_v51 = vld [vmem:[%s1747_s13 + $0x28] sm:$0xff]  ;;  %v313_v55 = vld [vmem:[%s1747_s13 + $0x18] sm:$0xff] }
  0x5f   : > { %1252 = vmatpush3.msra.mxu1 %v398_v23  ;;  %1142 = vmatpush3.msra.mxu0 %v365_v25  ;;  %v390_v49 = vld [vmem:[#allocation6 + $0x100] sm:$0xff]  ;;  %v317_v56 = vld [vmem:[%s1747_s13 + $0x38] sm:$0xff]  ;;  %v1765_v57 = vld [vmem:[#allocation8 + $0xf0] sm:$0xff] }
  0x60   : > { %1253 = vmatprep.subr.mxu1 %v397_v26  ;;  %1143 = vmatprep.subr.mxu0 %v380_v27  ;;  %v314_v52 = vld [vmem:[%s1747_s13 + $0x20] sm:$0xff]  ;;  %v321_v58 = vld [vmem:[%s1747_s13 + $0x58] sm:$0xff]  ;;  %v1768_v59 = vld [vmem:[#allocation8 + $0xe8] sm:$0xff] }
  0x61   : > { %1254 = vmatpush3.msra.mxu1 %v397_v26  ;;  %1144 = vmatpush3.msra.mxu0 %v364_v28  ;;  %v318_v53 = vld [vmem:[%s1747_s13 + $0x40] sm:$0xff]  ;;  %v324_v60 = vld [vmem:[%s1747_s13 + $0x70] sm:$0xff]  ;;  %v1775_v63 = vld [vmem:[#allocation8 + $0xd8] sm:$0xff] }
  0x62   : > { %1255 = vmatprep.subr.mxu1 %v396_v29  ;;  %1145 = vmatprep.subr.mxu0 %v379_v30  ;;  %v1771_v61 = vld [vmem:[#allocation8 + $0xe0] sm:$0xff]  ;;  %v316_v62 = vld [vmem:[%s1747_s13 + $0x30] sm:$0xff]  ;;  %v327_v2 = vld [vmem:[%s1747_s13 + $0x88] sm:$0xff] }
  0x63   : > { %1256 = vmatpush3.msra.mxu1 %v396_v29  ;;  %1146 = vmatpush3.msra.mxu0 %v363_v31  ;;  %v320_v0 = vld [vmem:[%s1747_s13 + $0x50] sm:$0xff]  ;;  %v1783_v3 = vld [vmem:[#allocation8 + $0xc8] sm:$0xff]  ;;  %v330_v4 = vld [vmem:[%s1747_s13 + $0xa0] sm:$0xff] }
  0x64   : > { %1257 = vmatprep.subr.mxu1 %v395_v32  ;;  %1147 = vmatprep.subr.mxu0 %v378_v33  ;;  %v1779_v1 = vld [vmem:[#allocation8 + $0xd0] sm:$0xff]  ;;  %v1787_v5 = vld [vmem:[#allocation8 + $0xc0] sm:$0xff]  ;;  %v319_v6 = vld [vmem:[%s1747_s13 + $0x48] sm:$0xff] }
  0x65   : > { %1258 = vmatpush3.msra.mxu1 %v395_v32  ;;  %1148 = vmatpush3.msra.mxu0 %v362_v34  ;;  %v1791_v7 = vld [vmem:[#allocation8 + $0xb8] sm:$0xff]  ;;  %v323_v8 = vld [vmem:[%s1747_s13 + $0x68] sm:$0xff]  ;;  %v1795_v9 = vld [vmem:[#allocation8 + $0xb0] sm:$0xff] }
  0x66   : > { %1259 = vmatprep.subr.mxu1 %v394_v35  ;;  %1149 = vmatprep.subr.mxu0 %v377_v36  ;;  %v333_v10 = vld [vmem:[%s1747_s13 + $0xb8] sm:$0xff]  ;;  %v1799_v11 = vld [vmem:[#allocation8 + $0xa8] sm:$0xff]  ;;  %v336_v12 = vld [vmem:[%s1747_s13 + $0xd0] sm:$0xff] }
  0x67   : > { %1260 = vmatpush3.msra.mxu1 %v394_v35  ;;  %1150 = vmatpush3.msra.mxu0 %v361_v37  ;;  %v1803_v13 = vld [vmem:[#allocation8 + $0xa0] sm:$0xff]  ;;  %v1807_v15 = vld [vmem:[#allocation8 + $0x98] sm:$0xff]  ;;  %v1811_v17 = vld [vmem:[#allocation8 + $0x90] sm:$0xff] }
  0x68   : > { %1261 = vmatprep.subr.mxu1 %v393_v38  ;;  %1151 = vmatprep.subr.mxu0 %v376_v39  ;;  %v322_v14 = vld [vmem:[%s1747_s13 + $0x60] sm:$0xff]  ;;  %v339_v18 = vld [vmem:[%s1747_s13 + $0xe8] sm:$0xff]  ;;  %v325_v22 = vld [vmem:[%s1747_s13 + $0x78] sm:$0xff] }
  0x69   : > { %1262 = vmatpush3.msra.mxu1 %v393_v38  ;;  %1152 = vmatpush3.msra.mxu0 %v360_v40  ;;  %v326_v16 = vld [vmem:[%s1747_s13 + $0x80] sm:$0xff]  ;;  %v1815_v19 = vld [vmem:[#allocation8 + $0x88] sm:$0xff]  ;;  %v329_v23 = vld [vmem:[%s1747_s13 + $0x98] sm:$0xff] }
  0x6a   : > { %1263 = vmatprep.subr.mxu1 %v392_v41  ;;  %1153 = vmatprep.subr.mxu0 %v375_v42  ;;  %v342_v20 = vld [vmem:[%s1747_s13 + $0x100] sm:$0xff]  ;;  %v1825_v24 = vld [vmem:[#allocation8 + $0x78] sm:$0xff]  ;;  %v348_v26 = vld [vmem:[%s1747_s13 + $0x130] sm:$0xff] }
  0x6b   : > { %1264 = vmatpush3.msra.mxu1 %v392_v41  ;;  %1154 = vmatpush3.msra.mxu0 %v359_v43  ;;  %v1819_v21 = vld [vmem:[#allocation8 + $0x80] sm:$0xff]  ;;  %v345_v25 = vld [vmem:[%s1747_s13 + $0x118] sm:$0xff]  ;;  %v761_v27 = vld [vmem:[#allocation8 + $0x70] sm:$0xff] }
  0x6c   : > { %1265 = vmatprep.subr.mxu1 %v391_v44  ;;  %1155 = vmatprep.subr.mxu0 %v374_v45  ;;  %v328_v28 = vld [vmem:[%s1747_s13 + $0x90] sm:$0xff]  ;;  %v760_v30 = vld [vmem:[#allocation8 + $0x68] sm:$0xff]  ;;  %v354_v32 = vld [vmem:[%s1747_s13 + $0x160] sm:$0xff] }
  0x6d   : > { %470 = vmatprep.mubr.f32.mxu0 %v311_v46  ;;  %1156 = vmatpush3.msra.mxu0 %v358_v47  ;;  %v332_v29 = vld [vmem:[%s1747_s13 + $0xb0] sm:$0xff]  ;;  %v351_v31 = vld [vmem:[%s1747_s13 + $0x148] sm:$0xff]  ;;  %v759_v33 = vld [vmem:[#allocation8 + $0x60] sm:$0xff] }
  0x6e   : > { %1266 = vmatpush3.msra.mxu1 %v391_v44  ;;  %471 = vmatmul.mubr.f32.vlgmr.msra.gmra.mxu0 %v310_v48  ;;  %v331_v34 = vld [vmem:[%s1747_s13 + $0xa8] sm:$0xff]  ;;  %v758_v36 = vld [vmem:[#allocation8 + $0x58] sm:$0xff]  ;;  %v757_v38 = vld [vmem:[#allocation8 + $0x50] sm:$0xff] }
  0x6f   : > { %1267 = vmatprep.subr.mxu1 %v390_v49  ;;  %1269 = vmatprep.mubr.f32.mxu1 %v312_v50  ;;  %v335_v35 = vld [vmem:[%s1747_s13 + $0xc8] sm:$0xff]  ;;  %v357_v37 = vld [vmem:[%s1747_s13 + $0x178] sm:$0xff]  ;;  %v334_v39 = vld [vmem:[%s1747_s13 + $0xc0] sm:$0xff] }
  0x70   : > { %1268 = vmatpush3.msra.mxu1 %v390_v49  ;;  %475 = vmatprep.mubr.f32.mxu0 %v314_v52  ;;  %v756_v40 = vld [vmem:[#allocation8 + $0x48] sm:$0xff]  ;;  %v338_v41 = vld [vmem:[%s1747_s13 + $0xe0] sm:$0xff]  ;;  %v754_v43 = vld [vmem:[#allocation8 + $0x38] sm:$0xff] }
  0x71   : > { %1270 = vmatmul.mubr.f32.vlgmr.msra.gmra.mxu1 %v315_v51  ;;  %791 = vmatprep.subr.mxu0 %v778_v54  ;;  %v755_v42 = vld [vmem:[#allocation8 + $0x40] sm:$0xff]  ;;  %v337_v44 = vld [vmem:[%s1747_s13 + $0xd8] sm:$0xff]  ;;  %v340_v46 = vld [vmem:[%s1747_s13 + $0xf0] sm:$0xff] }
  0x72   : > { %1272 = vmatprep.mubr.f32.mxu1 %v318_v53  ;;  %476 = vmatmul.mubr.f32.gmra.mxu0 %v313_v55  ;;  %v341_v45 = vld [vmem:[%s1747_s13 + $0xf8] sm:$0xff]  ;;  %v344_v47 = vld [vmem:[%s1747_s13 + $0x110] sm:$0xff]  ;;  %v343_v48 = vld [vmem:[%s1747_s13 + $0x108] sm:$0xff] }
  0x73   : > { %1293 = vmatprep.subr.mxu1 %v778_v54  ;;  %480 = vmatprep.mubr.f32.mxu0 %v317_v56  ;;  %v347_v49 = vld [vmem:[%s1747_s13 + $0x128] sm:$0xff]  ;;  %v346_v50 = vld [vmem:[%s1747_s13 + $0x120] sm:$0xff]  ;;  %v349_v52 = vld [vmem:[%s1747_s13 + $0x138] sm:$0xff] }
  0x74   : > { %792 = vmatpush1.msra.mxu0 %v1765_v57  ;;  %1309 = vmatpush1.msra.mxu1 %v1765_v57  ;;  %v350_v51 = vld [vmem:[%s1747_s13 + $0x140] sm:$0xff]  ;;  %v353_v53 = vld [vmem:[%s1747_s13 + $0x158] sm:$0xff]  ;;  %v352_v54 = vld [vmem:[%s1747_s13 + $0x150] sm:$0xff] }
  0x75   : > { %1273 = vmatmul.mubr.f32.gmra.mxu1 %v321_v58  ;;  %793 = vmatprep.subr.mxu0 %v1768_v59  ;;  %v356_v55 = vld [vmem:[%s1747_s13 + $0x170] sm:$0xff]  ;;  %v355_v56 = vld [vmem:[%s1747_s13 + $0x168] sm:$0xff] }
  0x76   : > { %1275 = vmatprep.mubr.f32.mxu1 %v324_v60  ;;  %794 = vmatpush1.msra.mxu0 %v1771_v61  ;;  %v753_v57 = vld [vmem:[#allocation8 + $0x30] sm:$0xff]  ;;  %v752_v58 = vld [vmem:[#allocation8 + $0x28] sm:$0xff]  ;;  %v750_v60 = vld [vmem:[#allocation8 + $0x18] sm:$0xff] }
  0x77   : > { %481 = vmatmul.mubr.f32.gmra.mxu0 %v316_v62  ;;  %795 = vmatprep.subr.mxu0 %v1775_v63  ;;  %v748_v62 = vld [vmem:[#allocation8 + $0x8] sm:$0xff] }
  0x78   : > { %485 = vmatprep.mubr.f32.mxu0 %v320_v0  ;;  %796 = vmatpush1.msra.mxu0 %v1779_v1  ;;  %v1595_v0 = vmov 0.0  }
  0x79   : > { %1276 = vmatmul.mubr.f32.gmra.mxu1 %v327_v2  ;;  %797 = vmatprep.subr.mxu0 %v1783_v3 }
  0x7a   : > { %1278 = vmatprep.mubr.f32.mxu1 %v330_v4  ;;  %798 = vmatpush1.msra.mxu0 %v1787_v5 }
  0x7b   : > { %486 = vmatmul.mubr.f32.gmra.mxu0 %v319_v6  ;;  %799 = vmatprep.subr.mxu0 %v1791_v7 }
  0x7c   : > { %490 = vmatprep.mubr.f32.mxu0 %v323_v8  ;;  %800 = vmatpush1.msra.mxu0 %v1795_v9 }
  0x7d   : > { %1279 = vmatmul.mubr.f32.gmra.mxu1 %v333_v10  ;;  %801 = vmatprep.subr.mxu0 %v1799_v11 }
  0x7e   : > { %1281 = vmatprep.mubr.f32.mxu1 %v336_v12  ;;  %802 = vmatpush1.msra.mxu0 %v1803_v13 }
  0x7f   : > { %491 = vmatmul.mubr.f32.gmra.mxu0 %v322_v14  ;;  %803 = vmatprep.subr.mxu0 %v1807_v15 }
  0x80   : > { %495 = vmatprep.mubr.f32.mxu0 %v326_v16  ;;  %804 = vmatpush1.msra.mxu0 %v1811_v17 }
  0x81   : > { %1282 = vmatmul.mubr.f32.gmra.mxu1 %v339_v18  ;;  %805 = vmatprep.subr.mxu0 %v1815_v19 }
  0x82   : > { %1284 = vmatprep.mubr.f32.mxu1 %v342_v20  ;;  %806 = vmatpush1.msra.mxu0 %v1819_v21 }
  0x83   : > { %496 = vmatmul.mubr.f32.gmra.mxu0 %v325_v22  ;;  %807 = vmatprep.subr.mxu0 %v1825_v24 }
  0x84   : > { %500 = vmatprep.mubr.f32.mxu0 %v329_v23  ;;  %1294 = vmatprep.subr.mxu1 %v1768_v59  ;;  %v751_v59 = vld [vmem:[#allocation8 + $0x20] sm:$0xff] }
  0x85   : > { %1285 = vmatmul.mubr.f32.gmra.mxu1 %v345_v25  ;;  %808 = vmatpush1.msra.mxu0 %v761_v27 }
  0x86   : > { %1287 = vmatprep.mubr.f32.mxu1 %v348_v26  ;;  %1310 = vmatpush1.msra.mxu1 %v1771_v61  ;;  %v749_v61 = vld [vmem:[#allocation8 + $0x10] sm:$0xff] }
  0x87   : > { %501 = vmatmul.mubr.f32.gmra.mxu0 %v328_v28  ;;  %809 = vmatprep.subr.mxu0 %v760_v30 }
  0x88   : > { %505 = vmatprep.mubr.f32.mxu0 %v332_v29  ;;  %1295 = vmatprep.subr.mxu1 %v1775_v63  ;;  %v747_v63 = vld [vmem:[#allocation8] sm:$0xff] }
  0x89   : > { %1288 = vmatmul.mubr.f32.gmra.mxu1 %v351_v31  ;;  %810 = vmatpush1.msra.mxu0 %v759_v33 }
  0x8a   : > { %1290 = vmatprep.mubr.f32.mxu1 %v354_v32  ;;  %1311 = vmatpush1.msra.mxu1 %v1779_v1 }
  0x8b   : > { %506 = vmatmul.mubr.f32.gmra.mxu0 %v331_v34  ;;  %811 = vmatprep.subr.mxu0 %v758_v36 }
  0x8c   : > { %510 = vmatprep.mubr.f32.mxu0 %v335_v35  ;;  %1296 = vmatprep.subr.mxu1 %v1783_v3 }
  0x8d   : > { %1291 = vmatmul.mubr.f32.gmra.mxu1 %v357_v37  ;;  %812 = vmatpush1.msra.mxu0 %v757_v38 }
  0x8e   : > { %1312 = vmatpush1.msra.mxu1 %v1787_v5  ;;  %813 = vmatprep.subr.mxu0 %v756_v40 }
  0x8f   : > { %511 = vmatmul.mubr.f32.gmra.mxu0 %v334_v39  ;;  %1297 = vmatprep.subr.mxu1 %v1791_v7 }
  0x90   : > { %515 = vmatprep.mubr.f32.mxu0 %v338_v41  ;;  %814 = vmatpush1.msra.mxu0 %v755_v42 }
  0x91   : > { %1313 = vmatpush1.msra.mxu1 %v1795_v9  ;;  %815 = vmatprep.subr.mxu0 %v754_v43 }
  0x92   : > { %1298 = vmatprep.subr.mxu1 %v1799_v11  ;;  %816 = vmatpush1.msra.mxu0 %v753_v57 }
  0x93   : > { %516 = vmatmul.mubr.f32.gmra.mxu0 %v337_v44  ;;  %1314 = vmatpush1.msra.mxu1 %v1803_v13 }
  0x94   : > { %520 = vmatprep.mubr.f32.mxu0 %v341_v45  ;;  %1299 = vmatprep.subr.mxu1 %v1807_v15 }
  0x95   : > { %1315 = vmatpush1.msra.mxu1 %v1811_v17  ;;  %817 = vmatprep.subr.mxu0 %v752_v58 }
  0x96   : > { %1300 = vmatprep.subr.mxu1 %v1815_v19  ;;  %818 = vmatpush1.msra.mxu0 %v751_v59 }
  0x97   : > { %521 = vmatmul.mubr.f32.gmra.mxu0 %v340_v46  ;;  %1316 = vmatpush1.msra.mxu1 %v1819_v21 }
  0x98   : > { %525 = vmatprep.mubr.f32.mxu0 %v344_v47  ;;  %1301 = vmatprep.subr.mxu1 %v1825_v24 }
  0x99   : > { %1317 = vmatpush1.msra.mxu1 %v761_v27  ;;  %819 = vmatprep.subr.mxu0 %v750_v60 }
  0x9a   : > { %1302 = vmatprep.subr.mxu1 %v760_v30  ;;  %820 = vmatpush1.msra.mxu0 %v749_v61 }
  0x9b   : > { %526 = vmatmul.mubr.f32.gmra.mxu0 %v343_v48  ;;  %1318 = vmatpush1.msra.mxu1 %v759_v33 }
  0x9c   : > { %530 = vmatprep.mubr.f32.mxu0 %v347_v49  ;;  %1303 = vmatprep.subr.mxu1 %v758_v36 }
  0x9d   : > { %1319 = vmatpush1.msra.mxu1 %v757_v38  ;;  %821 = vmatprep.subr.mxu0 %v748_v62 }
  0x9e   : > { %1304 = vmatprep.subr.mxu1 %v756_v40  ;;  %822 = vmatpush1.msra.mxu0 %v747_v63 }
  0x9f   : > { %531 = vmatmul.mubr.f32.gmra.mxu0 %v346_v50  ;;  %1320 = vmatpush1.msra.mxu1 %v755_v42 }
  0xa0   : > { %535 = vmatprep.mubr.f32.mxu0 %v350_v51  ;;  %1305 = vmatprep.subr.mxu1 %v754_v43 }
  0xa1   : > { %1321 = vmatpush1.msra.mxu1 %v753_v57  ;;  %879 = vmatprep.mubr.f32.mxu1 %v1595_v0 }
  0xa2   : > { %1306 = vmatprep.subr.mxu1 %v752_v58 }
  0xa3   : > { %536 = vmatmul.mubr.f32.gmra.mxu0 %v349_v52  ;;  %1322 = vmatpush1.msra.mxu1 %v751_v59 }
  0xa4   : > { %540 = vmatprep.mubr.f32.mxu0 %v353_v53  ;;  %1307 = vmatprep.subr.mxu1 %v750_v60 }
  0xa5   : > { %1323 = vmatpush1.msra.mxu1 %v749_v61 }
  0xa6   : > { %1308 = vmatprep.subr.mxu1 %v748_v62 }
  0xa7   : > { %541 = vmatmul.mubr.f32.gmra.mxu0 %v352_v54  ;;  %1324 = vmatpush1.msra.mxu1 %v747_v63 }
  0xa8   : > { %545 = vmatprep.mubr.f32.mxu0 %v356_v55 }
  0xab   : > { %546 = vmatmul.mubr.f32.gmra.mxu0 %v355_v56 }
  0xac   : > { %855 = vmatprep.mubr.f32.mxu0 %v1595_v0 }
 0x12e   : > { %v1157_v1 = vpop.f32.mrf.mxu0 }
 0x130   : > { %v1158_v2 = vpop.f32.mrf.mxu0 }
 0x131   : > { %v1271_v3 = vpop.f32.mrf.mxu1  ;;  %v1159_v4 = vadd.f32 %v1158_v2, %v1157_v1 }
 0x132   : > { %v1160_v5 = vpop.f32.mrf.mxu0 }
 0x133   : > { %v617_v6 = vpop.f32.mrf.mxu1 }
 0x134   : > { %v618_v7 = vadd.f32 %v1159_v4, %v617_v6  ;;  %v1161_v8 = vpop.f32.mrf.mxu0 }
 0x135   : > { %v1274_v9 = vpop.f32.mrf.mxu1  ;;  %v1162_v10 = vadd.f32 %v1161_v8, %v1160_v5 }
 0x136   : > { %856 = vmatmul.mubr.f32.vlgmr.msra.gmra.mxu0 %v618_v7 }
 0x137   : > { %v1163_v11 = vpop.f32.mrf.mxu0  ;;  %861 = vmatprep.mubr.f32.mxu0 %v1595_v0  ;;  %v623_v12 = vadd.f32 %v1271_v3, %v1162_v10  ;;  %v627_v14 = vpop.f32.mrf.mxu1 }
 0x139   : > { %v1164_v13 = vpop.f32.mrf.mxu0  ;;  %v1277_v21 = vpop.f32.mrf.mxu1 }
 0x13a   : > { %v1165_v15 = vadd.f32 %v1164_v13, %v1163_v11  ;;  %862 = vmatmul.mubr.f32.gmra.mxu0 %v623_v12 }
 0x13b   : > { %v1166_v16 = vpop.f32.mrf.mxu0  ;;  %867 = vmatprep.mubr.f32.mxu0 %v1595_v0  ;;  %v637_v25 = vpop.f32.mrf.mxu1 }
 0x13c   : > { %v628_v17 = vadd.f32 %v1165_v15, %v627_v14 }
 0x13d   : > { %v1167_v18 = vpop.f32.mrf.mxu0  ;;  %v1280_v31 = vpop.f32.mrf.mxu1 }
 0x13e   : > { %v1168_v19 = vadd.f32 %v1167_v18, %v1166_v16  ;;  %868 = vmatmul.mubr.f32.gmra.mxu0 %v628_v17  ;;  %v781_v18 = vlaneseq }
 0x13f   : > { %v1169_v20 = vpop.f32.mrf.mxu0  ;;  %873 = vmatprep.mubr.f32.mxu0 %v1595_v0  ;;  %v647_v35 = vpop.f32.mrf.mxu1 }
 0x140   : > { %v633_v22 = vadd.f32 %v1274_v9, %v1168_v19  ;;  %v782_v19 = vshrl.u32 %v781_v18, 7 }
 0x141   : > { %v1170_v23 = vpop.f32.mrf.mxu0  ;;  %v1283_v41 = vpop.f32.mrf.mxu1 }
 0x142   : > { %v1171_v24 = vadd.f32 %v1170_v23, %v1169_v20  ;;  %874 = vmatmul.mubr.f32.gmra.mxu0 %v633_v22  ;;  %v783_v20 = vsub.s32 0, %v782_v19  ;;  %v787_v22 = vsub.s32 1, %v782_v19 }
 0x143   : > { %v1172_v26 = vpop.f32.mrf.mxu0  ;;  %v657_v45 = vpop.f32.mrf.mxu1 }
 0x144   : > { %v638_v27 = vadd.f32 %v1171_v24, %v637_v25 }
 0x145   : > { %v1173_v28 = vpop.f32.mrf.mxu0  ;;  %v1286_v51 = vpop.f32.mrf.mxu1 }
 0x146   : > { %v1174_v29 = vadd.f32 %v1173_v28, %v1172_v26  ;;  %880 = vmatmul.mubr.f32.vlgmr.msra.gmra.mxu1 %v638_v27 }
 0x147   : > { %v1175_v30 = vpop.f32.mrf.mxu0  ;;  %885 = vmatprep.mubr.f32.mxu1 %v1595_v0  ;;  %v667_v55 = vpop.f32.mrf.mxu1 }
 0x148   : > { %v643_v32 = vadd.f32 %v1277_v21, %v1174_v29  ;;  %v779_v21 = vld [vmem:[%s2016_s3] sm:$0x3] }
 0x149   : > { %v1176_v33 = vpop.f32.mrf.mxu0  ;;  %v1289_v61 = vpop.f32.mrf.mxu1  ;;  %v1889_v23 = vrot.slane %v779_v21, %v783_v20  ;;  %v1891_v24 = vrot.slane %v779_v21, %v787_v22 }
 0x14a   : > { %v1177_v34 = vadd.f32 %v1176_v33, %v1175_v30  ;;  %886 = vmatmul.mubr.f32.gmra.mxu1 %v643_v32 }
 0x14b   : > { %v1178_v36 = vpop.f32.mrf.mxu0  ;;  %891 = vmatprep.mubr.f32.mxu1 %v1595_v0  ;;  %v677_v2 = vpop.f32.mrf.mxu1 }
 0x14c   : > { %v648_v37 = vadd.f32 %v1177_v34, %v647_v35 }
 0x14d   : > { %v1179_v38 = vpop.f32.mrf.mxu0  ;;  %v1292_v8 = vpop.f32.mrf.mxu1 }
 0x14e   : > { %v1180_v39 = vadd.f32 %v1179_v38, %v1178_v36  ;;  %892 = vmatmul.mubr.f32.gmra.mxu1 %v648_v37 }
 0x14f   : > { %v1181_v40 = vpop.f32.mrf.mxu0  ;;  %897 = vmatprep.mubr.f32.mxu1 %v1595_v0  ;;  %v687_v12 = vpop.f32.mrf.mxu1 }
 0x150   : > { %v653_v42 = vadd.f32 %v1280_v31, %v1180_v39 }
 0x151   : > { %v1182_v43 = vpop.f32.mrf.mxu0 }
 0x152   : > { %v1183_v44 = vadd.f32 %v1182_v43, %v1181_v40  ;;  %898 = vmatmul.mubr.f32.gmra.mxu1 %v653_v42 }
 0x153   : > { %v1184_v46 = vpop.f32.mrf.mxu0  ;;  %903 = vmatprep.mubr.f32.mxu1 %v1595_v0 }
 0x154   : > { %v658_v47 = vadd.f32 %v1183_v44, %v657_v45 }
 0x155   : > { %v1185_v48 = vpop.f32.mrf.mxu0 }
 0x156   : > { %v1186_v49 = vadd.f32 %v1185_v48, %v1184_v46  ;;  %904 = vmatmul.mubr.f32.gmra.mxu1 %v658_v47 }
 0x157   : > { %v1187_v50 = vpop.f32.mrf.mxu0  ;;  %909 = vmatprep.mubr.f32.mxu1 %v1595_v0 }
 0x158   : > { %v663_v52 = vadd.f32 %v1283_v41, %v1186_v49 }
 0x159   : > { %v1188_v53 = vpop.f32.mrf.mxu0 }
 0x15a   : > { %v1189_v54 = vadd.f32 %v1188_v53, %v1187_v50  ;;  %910 = vmatmul.mubr.f32.gmra.mxu1 %v663_v52 }
 0x15b   : > { %v1190_v56 = vpop.f32.mrf.mxu0  ;;  %915 = vmatprep.mubr.f32.mxu1 %v1595_v0 }
 0x15c   : > { %v668_v57 = vadd.f32 %v1189_v54, %v667_v55 }
 0x15d   : > { %v1191_v58 = vpop.f32.mrf.mxu0 }
 0x15e   : > { %v1192_v59 = vadd.f32 %v1191_v58, %v1190_v56  ;;  %916 = vmatmul.mubr.f32.gmra.mxu1 %v668_v57 }
 0x15f   : > { %v1193_v60 = vpop.f32.mrf.mxu0  ;;  %921 = vmatprep.mubr.f32.mxu1 %v1595_v0 }
 0x160   : > { %v673_v62 = vadd.f32 %v1286_v51, %v1192_v59 }
 0x161   : > { %v1194_v63 = vpop.f32.mrf.mxu0 }
 0x162   : > { %v1195_v1 = vadd.f32 %v1194_v63, %v1193_v60  ;;  %922 = vmatmul.mubr.f32.gmra.mxu1 %v673_v62 }
 0x163   : > { %v1196_v3 = vpop.f32.mrf.mxu0  ;;  %927 = vmatprep.mubr.f32.mxu1 %v1595_v0 }
 0x164   : > { %v678_v4 = vadd.f32 %v1195_v1, %v677_v2 }
 0x165   : > { %v1197_v5 = vpop.f32.mrf.mxu0 }
 0x166   : > { %v1198_v6 = vadd.f32 %v1197_v5, %v1196_v3  ;;  %928 = vmatmul.mubr.f32.gmra.mxu1 %v678_v4 }
 0x167   : > { %v1199_v7 = vpop.f32.mrf.mxu0  ;;  %933 = vmatprep.mubr.f32.mxu1 %v1595_v0 }
 0x168   : > { %v683_v9 = vadd.f32 %v1289_v61, %v1198_v6 }
 0x169   : > { %v1200_v10 = vpop.f32.mrf.mxu0 }
 0x16a   : > { %v1201_v11 = vadd.f32 %v1200_v10, %v1199_v7  ;;  %934 = vmatmul.mubr.f32.gmra.mxu1 %v683_v9 }
 0x16b   : > { %v1202_v13 = vpop.f32.mrf.mxu0  ;;  %939 = vmatprep.mubr.f32.mxu1 %v1595_v0 }
 0x16c   : > { %v688_v14 = vadd.f32 %v1201_v11, %v687_v12 }
 0x16d   : > { %v1203_v15 = vpop.f32.mrf.mxu0 }
 0x16e   : > { %v1204_v16 = vadd.f32 %v1203_v15, %v1202_v13  ;;  %940 = vmatmul.mubr.f32.gmra.mxu1 %v688_v14 }
 0x16f   : > { %945 = vmatprep.mubr.f32.mxu1 %v1595_v0 }
 0x170   : > { %v693_v17 = vadd.f32 %v1292_v8, %v1204_v16 }
 0x172   : > { %946 = vmatmul.mubr.f32.gmra.mxu1 %v693_v17 }
 0x1f6   : > { %v857_v25 = vpop.f32.mrf.mxu0 }
 0x1f7   : > { %v858_v26 = vadd.f32 %v857_v25, %v1889_v23 }
 0x1f8   : > { %v859_v27 = vpop.f32.mrf.mxu0 }
 0x1f9   : > { %952 = vst [vmem:[%s1894_s8] sm:$0xff] %v858_v26  ;;  %v860_v0 = vadd.f32 %v859_v27, %v1891_v24 }
 0x1fa   : > { %v863_v28 = vpop.f32.mrf.mxu0 }
 0x1fb   : > { %953 = vst [vmem:[%s1894_s8 + $0x8] sm:$0xff] %v860_v0  ;;  %v864_v29 = vadd.f32 %v863_v28, %v1889_v23 }
 0x1fc   : > { %v865_v30 = vpop.f32.mrf.mxu0 }
 0x1fd   : > { %954 = vst [vmem:[%s1894_s8 + $0x10] sm:$0xff] %v864_v29  ;;  %v866_v31 = vadd.f32 %v865_v30, %v1891_v24 }
 0x1fe   : > { %v869_v32 = vpop.f32.mrf.mxu0 }
 0x1ff   : > { %955 = vst [vmem:[%s1894_s8 + $0x18] sm:$0xff] %v866_v31  ;;  %v870_v33 = vadd.f32 %v869_v32, %v1889_v23 }
 0x200   : > { %v871_v34 = vpop.f32.mrf.mxu0 }
 0x201   : > { %956 = vst [vmem:[%s1894_s8 + $0x20] sm:$0xff] %v870_v33  ;;  %v872_v35 = vadd.f32 %v871_v34, %v1891_v24 }
 0x202   : > { %v875_v36 = vpop.f32.mrf.mxu0 }
 0x203   : > { %957 = vst [vmem:[%s1894_s8 + $0x28] sm:$0xff] %v872_v35  ;;  %v876_v37 = vadd.f32 %v875_v36, %v1889_v23 }
 0x204   : > { %v877_v38 = vpop.f32.mrf.mxu0 }
 0x205   : > { %958 = vst [vmem:[%s1894_s8 + $0x30] sm:$0xff] %v876_v37  ;;  %v878_v39 = vadd.f32 %v877_v38, %v1891_v24 }
 0x206   : > { %v881_v40 = vpop.f32.mrf.mxu1 }
 0x207   : > { %959 = vst [vmem:[%s1894_s8 + $0x38] sm:$0xff] %v878_v39  ;;  %v882_v41 = vadd.f32 %v881_v40, %v1889_v23 }
 0x208   : > { %v883_v42 = vpop.f32.mrf.mxu1 }
 0x209   : > { %960 = vst [vmem:[%s1894_s8 + $0x40] sm:$0xff] %v882_v41  ;;  %v884_v43 = vadd.f32 %v883_v42, %v1891_v24 }
 0x20a   : > { %v887_v44 = vpop.f32.mrf.mxu1 }
 0x20b   : > { %961 = vst [vmem:[%s1894_s8 + $0x48] sm:$0xff] %v884_v43  ;;  %v888_v45 = vadd.f32 %v887_v44, %v1889_v23 }
 0x20c   : > { %v889_v46 = vpop.f32.mrf.mxu1 }
 0x20d   : > { %962 = vst [vmem:[%s1894_s8 + $0x50] sm:$0xff] %v888_v45  ;;  %v890_v47 = vadd.f32 %v889_v46, %v1891_v24 }
 0x20e   : > { %v893_v48 = vpop.f32.mrf.mxu1 }
 0x20f   : > { %963 = vst [vmem:[%s1894_s8 + $0x58] sm:$0xff] %v890_v47  ;;  %v894_v49 = vadd.f32 %v893_v48, %v1889_v23 }
 0x210   : > { %v895_v50 = vpop.f32.mrf.mxu1 }
 0x211   : > { %964 = vst [vmem:[%s1894_s8 + $0x60] sm:$0xff] %v894_v49  ;;  %v896_v51 = vadd.f32 %v895_v50, %v1891_v24 }
 0x212   : > { %v899_v52 = vpop.f32.mrf.mxu1 }
 0x213   : > { %965 = vst [vmem:[%s1894_s8 + $0x68] sm:$0xff] %v896_v51  ;;  %v900_v53 = vadd.f32 %v899_v52, %v1889_v23 }
 0x214   : > { %v901_v54 = vpop.f32.mrf.mxu1 }
 0x215   : > { %966 = vst [vmem:[%s1894_s8 + $0x70] sm:$0xff] %v900_v53  ;;  %v902_v55 = vadd.f32 %v901_v54, %v1891_v24 }
 0x216   : > { %v905_v56 = vpop.f32.mrf.mxu1 }
 0x217   : > { %967 = vst [vmem:[%s1894_s8 + $0x78] sm:$0xff] %v902_v55  ;;  %v906_v57 = vadd.f32 %v905_v56, %v1889_v23 }
 0x218   : > { %v907_v58 = vpop.f32.mrf.mxu1 }
 0x219   : > { %968 = vst [vmem:[%s1894_s8 + $0x80] sm:$0xff] %v906_v57  ;;  %v908_v59 = vadd.f32 %v907_v58, %v1891_v24 }
 0x21a   : > { %v911_v60 = vpop.f32.mrf.mxu1 }
 0x21b   : > { %969 = vst [vmem:[%s1894_s8 + $0x88] sm:$0xff] %v908_v59  ;;  %v912_v61 = vadd.f32 %v911_v60, %v1889_v23 }
 0x21c   : > { %v913_v62 = vpop.f32.mrf.mxu1 }
 0x21d   : > { %970 = vst [vmem:[%s1894_s8 + $0x90] sm:$0xff] %v912_v61  ;;  %v914_v63 = vadd.f32 %v913_v62, %v1891_v24 }
 0x21e   : > { %v917_v1 = vpop.f32.mrf.mxu1 }
 0x21f   : > { %971 = vst [vmem:[%s1894_s8 + $0x98] sm:$0xff] %v914_v63  ;;  %v918_v2 = vadd.f32 %v917_v1, %v1889_v23 }
 0x220   : > { %v919_v3 = vpop.f32.mrf.mxu1 }
 0x221   : > { %972 = vst [vmem:[%s1894_s8 + $0xa0] sm:$0xff] %v918_v2  ;;  %v920_v4 = vadd.f32 %v919_v3, %v1891_v24 }
 0x222   : > { %v923_v5 = vpop.f32.mrf.mxu1 }
 0x223   : > { %973 = vst [vmem:[%s1894_s8 + $0xa8] sm:$0xff] %v920_v4  ;;  %v924_v6 = vadd.f32 %v923_v5, %v1889_v23 }
 0x224   : > { %v925_v7 = vpop.f32.mrf.mxu1 }
 0x225   : > { %974 = vst [vmem:[%s1894_s8 + $0xb0] sm:$0xff] %v924_v6  ;;  %v926_v8 = vadd.f32 %v925_v7, %v1891_v24 }
 0x226   : > { %v929_v9 = vpop.f32.mrf.mxu1 }
 0x227   : > { %975 = vst [vmem:[%s1894_s8 + $0xb8] sm:$0xff] %v926_v8  ;;  %v930_v10 = vadd.f32 %v929_v9, %v1889_v23 }
 0x228   : > { %v931_v11 = vpop.f32.mrf.mxu1 }
 0x229   : > { %976 = vst [vmem:[%s1894_s8 + $0xc0] sm:$0xff] %v930_v10  ;;  %v932_v12 = vadd.f32 %v931_v11, %v1891_v24 }
 0x22a   : > { %v935_v13 = vpop.f32.mrf.mxu1 }
 0x22b   : > { %977 = vst [vmem:[%s1894_s8 + $0xc8] sm:$0xff] %v932_v12  ;;  %v936_v14 = vadd.f32 %v935_v13, %v1889_v23 }
 0x22c   : > { %v937_v15 = vpop.f32.mrf.mxu1 }
 0x22d   : > { %978 = vst [vmem:[%s1894_s8 + $0xd0] sm:$0xff] %v936_v14  ;;  %v938_v16 = vadd.f32 %v937_v15, %v1891_v24 }
 0x22e   : > { %v941_v17 = vpop.f32.mrf.mxu1 }
 0x22f   : > { %979 = vst [vmem:[%s1894_s8 + $0xd8] sm:$0xff] %v938_v16  ;;  %v942_v18 = vadd.f32 %v941_v17, %v1889_v23 }
 0x230   : > { %v943_v19 = vpop.f32.mrf.mxu1 }
 0x231   : > { %980 = vst [vmem:[%s1894_s8 + $0xe0] sm:$0xff] %v942_v18  ;;  %v944_v20 = vadd.f32 %v943_v19, %v1891_v24 }
 0x232   : > { %v947_v21 = vpop.f32.mrf.mxu1 }
 0x233   : > { %981 = vst [vmem:[%s1894_s8 + $0xe8] sm:$0xff] %v944_v20  ;;  %v948_v22 = vadd.f32 %v947_v21, %v1889_v23 }
 0x234   : > { %v949_v25 = vpop.f32.mrf.mxu1 }
 0x235   : > { %982 = vst [vmem:[%s1894_s8 + $0xf0] sm:$0xff] %v948_v22  ;;  %v950_v26 = vadd.f32 %v949_v25, %v1891_v24 }
 0x237   : > { %983 = vst [vmem:[%s1894_s8 + $0xf8] sm:$0xff] %v950_v26 }
 0x238   : > { %1513 = shalt.err (!%p1510_p3)
}
 0x239   : > { %s1514_s11 = scalar_lea.hbm %s1961_s22, 4096  ;;  %s1518_s23 = scalar_lea.hbm %s2017_s4, 12288 }
 0x23a   : > { %p1515_p0 = scmp.ne.s32.totalorder %s1961_s22, %s1514_s11  ;;  %p1519_p6 = scmp.lt.s32.totalorder %s1961_s22, %s2017_s4 }
 0x23b   : > { %p1520_p11 = scmp.lt.s32.totalorder %s1518_s23, %s1514_s11 }
 0x23c   : > { %p1516_p1 = pnand %p1515_p0, %p1718_p7 }
 0x23d   : > { %p1521_p5 = por %p1520_p11, %p1519_p6 }
 0x23e   : > { %p1517_p4 = pneg %p1516_p1 }
 0x240   : > { %p1522_p8 = pnand %p1521_p5, %p1517_p4 }
 0x242   : > { %1525 = shalt.err (!%p1522_p8)
}
 0x243   : > { %s1597_s8 = smov 256   ;;  %s1598_s12 = smov 16  }
 0x244   : > { %1338 = dma.vmem_to_hbm [thread:$0]  (%p1718_p7), %s1963_s24, 4096, %s1961_s22, %s985_s18, %s1597_s8, %s1597_s8, %s1598_s12  }
 0x245 PF: > { %p1360_p9 = scmp.ge.s32.totalorder %s1584_s20, 2  ;;  %s1014_s14 = sand.u32 1, %s1564_s15  }
 0x246   : > { %p2033_p10 = scmp.ne.s32.totalorder %s2025_s26, 0  ;;  %s1015_s21 = scalar_lea.sflag [#allocation5], %s1014_s14 }
 0x248   : > { %p1352_p2 = pnand %p1360_p9, %p2033_p10 }
 0x24a   : > { %p1353_p12 = pneg %p1352_p2 }
 0x24c   : > { %1559 = dma.done.wait (%p1353_p12), %s1015_s21, 4096  }
 0x24d   : > { %1561 = vsyncadd (%p1353_p12), %s1015_s21, 4294963200  ;;  %s21_s20 = sadd.s32 1, %s1584_s20   ;;  %s2034_s15 = smov %s1568_s16 }
 0x24e   : > { %p18_p13 = scmp.ge.s32.totalorder %s21_s20, 5   ;;  %s2035_s16 = smov %s1572_s17 }
 0x24f   : > { %s2036_s17 = smov %s1730_s9  ;;  %s2037_s18 = smov %s1580_s19 }
 0x250   : > { %s2038_s19 = smov %s2040_s28  ;;  %20 = sbr.rel (!%p18_p13) target bundleno = 9 (0x9), region = 98 }
 0x255   :  { %1020 = vsyncpa [#allocation4], 1 }
 0x256   :  { %1022 = vsyncpa [#allocation4 + $0x1], 1 }
 0x257   :  { %1023 = vsyncpa [#allocation7], 1 }
 0x258   :  { %1024 = vsyncpa [#allocation5], 1 }
 0x259   :  { %1026 = vsyncpa [#allocation5 + $0x1], 1 }

</bundles_post_ra>
